<compile_context>
chip_gen: v6e
topology: v6e:2x2x1
jax: 0.10.0
libtpu: 0.0.40
codegen_flags: <defaults>
</compile_context>

<pallas_src>
import functools

import jax
import jax.numpy as jnp
from jax.experimental import pallas as pl
from jax.experimental.pallas import tpu as pltpu


# Target spatial columns (lanes) per grid step (multiple of 128).
# Kept at 16384 so the per-step footprint stays comfortably inside v5e's 16 MiB
# scoped default even before the explicit vmem_limit bump below.
_TM_TARGET = 16384
# Explicit scoped-VMEM budget: > the 16/32 MiB defaults, < v7x's 64 MiB physical.
_VMEM_LIMIT_BYTES = 48 << 20


# ----------------------------- Pallas kernel --------------------------------

def _focus_conv_kernel(x_ref, w_ref, bias_ref, o_ref):
    """x_ref: [K, TM] bf16   w_ref: [N, K] bf16   bias_ref: [N, 1] f32
    o_ref: [N, TM] (bf16 by default) — big spatial axis on lanes (lane-dense vst).

    Computes SiLU( w @ x + bias ).  BatchNorm scale is pre-folded into w,
    BatchNorm shift is `bias`.  Accumulate + SiLU in f32, store downcast.
    """
    acc = jnp.dot(w_ref[...], x_ref[...], preferred_element_type=jnp.float32)
    y = acc + bias_ref[...]                                   # folded BN shift
    o_ref[...] = (y * jax.nn.sigmoid(y)).astype(o_ref.dtype)  # SiLU


def _round_up(v, m):
    return ((v + m - 1) // m) * m


def _pick_tm(M, B):
    """Even 128-multiple split of M; >=2 spatial tiles when B == 1 (v7x 2xTC)."""
    if M <= 128:
        return M                       # tiny (test-sized) inputs: single block
    n_tiles = pl.cdiv(M, _TM_TARGET)
    if B == 1 and n_tiles == 1:
        n_tiles = 2                    # keep both TensorCores busy on v7x
    return min(_round_up(pl.cdiv(M, n_tiles), 128), M)


def _focus_conv_matmul(x_bkm, w_nk, bias_n1, out_dtype):
    """x_bkm: [B, K, M] bf16, w_nk: [N, K] bf16, bias_n1: [N, 1] f32.
    Returns [B, N, M] in out_dtype (bf16 hot path)."""
    B, K, M = x_bkm.shape
    N = w_nk.shape[0]
    TM = _pick_tm(M, B)
    grid = (B, pl.cdiv(M, TM))

    cost = pl.CostEstimate(
        flops=2 * B * M * K * N,
        transcendentals=B * M * N,     # sigmoid exp
        bytes_accessed=(B * M * K * jnp.dtype(x_bkm.dtype).itemsize
                        + K * N * jnp.dtype(w_nk.dtype).itemsize
                        + B * M * N * jnp.dtype(out_dtype).itemsize),
    )

    return pl.pallas_call(
        _focus_conv_kernel,
        out_shape=jax.ShapeDtypeStruct((B, N, M), out_dtype),
        grid_spec=pltpu.PrefetchScalarGridSpec(
            num_scalar_prefetch=0,
            grid=grid,
            in_specs=[
                pl.BlockSpec((None, K, TM), lambda b, m: (b, 0, m)),   # x tile
                pl.BlockSpec((N, K), lambda b, m: (0, 0)),             # weight (resident)
                pl.BlockSpec((N, 1), lambda b, m: (0, 0)),             # bias (resident)
            ],
            out_specs=pl.BlockSpec((None, N, TM), lambda b, m: (b, 0, m)),
        ),
        compiler_params=pltpu.CompilerParams(
            dimension_semantics=("parallel", "parallel"),
            vmem_limit_bytes=_VMEM_LIMIT_BYTES),
        cost_estimate=cost,
    )(x_bkm, w_nk, bias_n1)


# ------------------------------ Focus wrapper --------------------------------

def space_to_depth_focus(x):
    """x: NCHW [B, C, H, W] -> [B, 4C, H/2, W/2], channel order matching
    torch.cat((top_left, bot_left, top_right, bot_right), dim=1)."""
    tl = x[..., ::2, ::2]
    tr = x[..., ::2, 1::2]
    bl = x[..., 1::2, ::2]
    br = x[..., 1::2, 1::2]
    return jnp.concatenate((tl, bl, tr, br), axis=1)


@functools.partial(jax.jit, static_argnames=("eps", "out_dtype"))
def focus_forward(x, conv_w, bn_gamma, bn_beta, bn_mean, bn_var,
                  eps=1e-5, out_dtype=jnp.bfloat16):
    """Focus.forward: space-to-depth, then BaseConv (1x1 conv, no conv bias)
    + BatchNorm (inference) + SiLU.

    x:       [B, C, H, W]        (NCHW, H and W even)
    conv_w:  [Cout, 4C, 1, 1]    (PyTorch Conv2d weight layout)
    returns: [B, Cout, H/2, W/2] in out_dtype (default bf16; cast outside if f32
             is truly needed — downstream CSPDarknet stages consume bf16).
    """
    B, C, H, W = x.shape
    Cout = conv_w.shape[0]
    H2, W2 = H // 2, W // 2
    K = 4 * C
    M = H2 * W2

    # Space-to-depth + bf16 cast: one fused XLA pass (read f32, write bf16);
    # the channel-major reshape to [B, K, M] is free (adjacent-dim merge).
    xs = space_to_depth_focus(x)                              # [B, 4C, H2, W2]
    x_bkm = xs.reshape(B, K, M).astype(jnp.bfloat16)          # [B, K, M] bf16

    # Fold BatchNorm (inference) into the 1x1-conv weight and a per-channel bias
    # (fold done in f32, then weight cast to bf16; bias stays f32).
    scale = bn_gamma * jax.lax.rsqrt(bn_var + eps)            # [Cout]
    w_nk = (conv_w[:, :, 0, 0] * scale[:, None]).astype(jnp.bfloat16)   # [Cout, 4C]
    bias_n1 = (bn_beta - bn_mean * scale).reshape(Cout, 1).astype(jnp.float32)

    # hot path in Pallas
    y_bnm = _focus_conv_matmul(x_bkm, w_nk, bias_n1, out_dtype=out_dtype)  # [B, Cout, M]

    # back to NCHW with a pure reshape (no transpose)
    return y_bnm.reshape(B, Cout, H2, W2)


# --------------------------- pure-JAX reference -------------------------------

def _focus_reference(x, conv_w, bn_gamma, bn_beta, bn_mean, bn_var, eps=1e-5):
    xs = space_to_depth_focus(x)                              # [B, 4C, H2, W2]
    w = conv_w[:, :, 0, 0]                                    # [Cout, 4C]
    y = jnp.einsum('bkhw,nk->bnhw', xs, w)
    scale = bn_gamma / jnp.sqrt(bn_var + eps)
    y = y * scale[None, :, None, None] + (bn_beta - bn_mean * scale)[None, :, None, None]
    return y * jax.nn.sigmoid(y)


# ----------------------------------- main ------------------------------------

def _run_case(key, B, C, H, W, Cout):
    k_x, k_w, k_g, k_b, k_m, k_v = jax.random.split(key, 6)
    x = jax.random.normal(k_x, (B, C, H, W), dtype=jnp.float32)
    conv_w = jax.random.normal(k_w, (Cout, 4 * C, 1, 1), dtype=jnp.float32) * 0.1
    bn_gamma = 1.0 + 0.1 * jax.random.normal(k_g, (Cout,), dtype=jnp.float32)
    bn_beta = 0.1 * jax.random.normal(k_b, (Cout,), dtype=jnp.float32)
    bn_mean = 0.1 * jax.random.normal(k_m, (Cout,), dtype=jnp.float32)
    bn_var = jnp.abs(jax.random.normal(k_v, (Cout,), dtype=jnp.float32)) + 0.5

    out = focus_forward(x, conv_w, bn_gamma, bn_beta, bn_mean, bn_var)
    jax.block_until_ready(out)

    assert out.shape == (B, Cout, H // 2, W // 2), out.shape
    assert out.dtype == jnp.bfloat16, out.dtype

    ref = _focus_reference(x, conv_w, bn_gamma, bn_beta, bn_mean, bn_var)
    out_f32 = out.astype(jnp.float32)
    assert jnp.all(jnp.isfinite(out_f32))
    # bf16 hot path + bf16 output -> loose tolerance
    assert jnp.allclose(out_f32, ref, rtol=5e-2, atol=5e-2), \
        float(jnp.max(jnp.abs(out_f32 - ref)))


if __name__ == "__main__":
    key = jax.random.PRNGKey(0)
    k1, k2 = jax.random.split(key)

    # Case 1: small canonical shape (single block, as before).
    _run_case(k1, B=2, C=4, H=16, W=16, Cout=32)

    # Case 2: B=1 with M=560 — exercises the multi-tile grid (>=2 spatial tiles
    # for v7x), a ragged last tile, and non-8-multiple K/N (full-dim blocks).
    _run_case(k2, B=1, C=3, H=40, W=56, Cout=24)

    print("KERNEL_OK")
</pallas_src>

<mosaic_0001>
module attributes {stable_mosaic.version = 11 : i64} {
  func.func @_focus_conv_kernel(%arg0: i32, %arg1: i32, %arg2: memref<1x16x64xbf16, #tpu.memory_space<vmem>>, %arg3: memref<32x16xbf16, #tpu.memory_space<vmem>>, %arg4: memref<32x1xf32, #tpu.memory_space<vmem>>, %arg5: memref<1x32x64xbf16, #tpu.memory_space<vmem>>) attributes {dimension_semantics = [#tpu.dimension_semantics<parallel>, #tpu.dimension_semantics<parallel>], iteration_bounds = array<i64: 2, 1>, scalar_prefetch = 0 : i64, scratch_operands = 0 : i64, tpu.core_type = #tpu.core_type<tc>, window_params = [{transform_indices = @transform_0, window_bounds = array<i64: 1, 16, 64>}, {pipeline_mode = #tpu.pipeline_mode<synchronous>, transform_indices = @transform_1, window_bounds = array<i64: 32, 16>}, {pipeline_mode = #tpu.pipeline_mode<synchronous>, transform_indices = @transform_2, window_bounds = array<i64: 32, 1>}, {transform_indices = @transform_3, window_bounds = array<i64: 1, 32, 64>}]} {
    %c0 = arith.constant 0 : index
    %c0_0 = arith.constant 0 : index
    %0 = vector.load %arg3[%c0, %c0_0] : memref<32x16xbf16, #tpu.memory_space<vmem>>, vector<32x16xbf16>
    %c0_1 = arith.constant 0 : index
    %c0_2 = arith.constant 0 : index
    %c0_3 = arith.constant 0 : index
    %1 = vector.load %arg2[%c0_1, %c0_2, %c0_3] : memref<1x16x64xbf16, #tpu.memory_space<vmem>>, vector<1x16x64xbf16>
    %2 = vector.shape_cast %1 : vector<1x16x64xbf16> to vector<16x64xbf16>
    %cst = arith.constant dense<0.000000e+00> : vector<32x64xf32>
    %3 = tpu.matmul %0, %2, %cst {dimension_numbers = #tpu.dot_dimension_numbers<[1], [0], [0], [1], [0, 0, 1, 1], [], []>} : vector<32x16xbf16>, vector<16x64xbf16>, vector<32x64xf32> -> vector<32x64xf32>
    %c0_4 = arith.constant 0 : index
    %c0_5 = arith.constant 0 : index
    %4 = vector.load %arg4[%c0_4, %c0_5] : memref<32x1xf32, #tpu.memory_space<vmem>>, vector<32x1xf32>
    %5 = vector.broadcast %4 : vector<32x1xf32> to vector<32x64xf32>
    %6 = arith.addf %3, %5 : vector<32x64xf32>
    %7 = arith.negf %6 : vector<32x64xf32>
    %8 = math.exp %7 : vector<32x64xf32>
    %cst_6 = arith.constant 1.000000e+00 : f32
    %9 = vector.broadcast %cst_6 : f32 to vector<32x64xf32>
    %10 = arith.addf %9, %8 : vector<32x64xf32>
    %11 = arith.divf %9, %10 : vector<32x64xf32>
    %12 = arith.mulf %6, %11 : vector<32x64xf32>
    %13 = arith.truncf %12 : vector<32x64xf32> to vector<32x64xbf16>
    %c0_7 = arith.constant 0 : index
    %c0_8 = arith.constant 0 : index
    %c0_9 = arith.constant 0 : index
    %14 = vector.load %arg5[%c0_7, %c0_8, %c0_9] : memref<1x32x64xbf16, #tpu.memory_space<vmem>>, vector<1x32x64xbf16>
    %15 = vector.shape_cast %14 : vector<1x32x64xbf16> to vector<32x64xbf16>
    %16 = vector.shape_cast %13 : vector<32x64xbf16> to vector<1x32x64xbf16>
    tpu.vector_store %arg5[%c0_7, %c0_8, %c0_9], %16 {strides = array<i32>} : memref<1x32x64xbf16, #tpu.memory_space<vmem>>, vector<1x32x64xbf16>,
    return
  }
  func.func @transform_0(%arg0: i32, %arg1: i32) -> (i32, i32, i32) {
    %c0_i32 = arith.constant 0 : i32
    %c0_i32_0 = arith.constant 0 : i32
    return %arg0, %c0_i32, %arg1 : i32, i32, i32
  }
  func.func @transform_1(%arg0: i32, %arg1: i32) -> (i32, i32) {
    %c0_i32 = arith.constant 0 : i32
    %c0_i32_0 = arith.constant 0 : i32
    %c0_i32_1 = arith.constant 0 : i32
    return %c0_i32, %c0_i32_0 : i32, i32
  }
  func.func @transform_2(%arg0: i32, %arg1: i32) -> (i32, i32) {
    %c0_i32 = arith.constant 0 : i32
    %c0_i32_0 = arith.constant 0 : i32
    %c0_i32_1 = arith.constant 0 : i32
    return %c0_i32, %c0_i32_0 : i32, i32
  }
  func.func @transform_3(%arg0: i32, %arg1: i32) -> (i32, i32, i32) {
    %c0_i32 = arith.constant 0 : i32
    %c0_i32_0 = arith.constant 0 : i32
    return %arg0, %c0_i32, %arg1 : i32, i32, i32
  }
}

</mosaic_0001>

<bundles_post_ra>
// kernel: focus_forward.1
= control target key start
LH: loop header
LB: loop body
LE: loop exit
PB: predicated region body
PF: predicated region fallthrough
CT: control target
= control target key end

     0   :  { %s567_s12 = smov 0   ;;  %s569_s13 = smov 0   ;;  %s624_s0 = inlined_call_operand.vmem [shape: bf16[2,16,64], index: 0, kind: input, shape index: {}]   ;;  %s625_s1 = inlined_call_operand.vmem [shape: bf16[32,16], index: 1, kind: input, shape index: {}]   ;;  %s626_s2 = inlined_call_operand.vmem [shape: f32[32,1], index: 2, kind: input, shape index: {}]   ;;  %s627_s3 = inlined_call_operand.vmem [shape: bf16[2,32,64], index: 3, kind: output, shape index: {}]  }
   0x1   :  { %s571_s14 = smov 0  }
   0x2 LB: > { %s25_s15 = sadd.s32 1, %s540_s13  ;;  %p441_p0 = scmp.ge.s32.totalorder %s544_s14, 1  ;;  %s544_s14 = sphi %s571_s14, %s13_s14   ;;  %s540_s13 = sphi %s569_s13, %s629_s13   ;;  %s536_s12 = sphi %s567_s12, %s628_s12  }
   0x3   : > { %p27_p1 = scmp.ge.s32.totalorder %s25_s15, 2  ;;  %p156_p2 = scmp.lt.s32.totalorder %s544_s14, 3 }
   0x5   : > { %s631_s15 = smov (%p27_p1, %s25_s15), 0  ;;  %p157_p3 = pnand %p441_p0, %p156_p2 }
   0x6   : > { %p186_p4 = scmp.lt.s32.totalorder (!%p157_p3), %s536_s12, 1 }
   0x7   : > { %160 = sbr.rel (%p157_p3) target bundleno = 258 (0x102), region = 32 }
   0xc   : > { %v504_v0 = vld [vmem:[%s625_s1] sm:$0xff]   ;;  %vm249_vm0 = vcmask 130048   ;;  %s633_s12 = smov (!%p186_p4, %s536_s12), 1  ;;  %v211_v1 = vld [vmem:[%s626_s2 + $0x10] sm:$0xff]  ;;  %v546_v3 = vmov 0   ;;  %v212_v4 = vld [vmem:[%s626_s2 + $0x18] sm:$0xff] }
   0xd   : > { %472 = vmatprep.mubr.msk.bf16.mxu0 %vm249_vm0, %v504_v0  ;;  %v209_v2 = vld [vmem:[%s626_s2] sm:$0xff]  ;;  %502 = vset.pattern.permute.xlu1 %v546_v3  ;;  %s461_s22 = sshll.u32 %s633_s12, 3  ;;  %v210_v5 = vld [vmem:[%s626_s2 + $0x8] sm:$0xff]  ;;  %s462_s5 = sshll.u32 %s633_s12, 4  ;;  %vm349_vm1 = vcmask 519168  }
   0xe   : > { %501 = vset.pattern.permute.xlu0 %v546_v3  ;;  %225 = vperm.xlu1 %502, %v211_v1   ;;  %s193_s25 = scalar_lea.vmem %s624_s0, %s461_s22  ;;  %v505_v7 = vld [vmem:[%s625_s1 + $0x8] sm:$0xff]   ;;  %s201_s8 = scalar_lea.vmem %s627_s3, %s462_s5 }
   0xf   : > { %215 = vperm.xlu0 %501, %v209_v2   ;;  %v503_v6 = vld [vmem:[%s193_s25] sm:$0xff]  }
  0x10   : > { %470 = vmatprep.subr.bf16.mxu0 %v503_v6 }
  0x11   : > { %471 = vmatpush3.bf16.msra.mxu0 %v503_v6 }
  0x12   : > { %230 = vperm.xlu1 %502, %v212_v4  }
  0x13   : > { %220 = vperm.xlu0 %501, %v210_v5  }
  0x14   : > { %473 = vmatmul.mubr.msk.bf16.vlgmr.msra.gmra.mxu0 %vm249_vm0, %v505_v7 }
  0x89   : > { %v226_v8 = vpop.permute.xlu1 %225 }
  0x8a   : > { %v216_v9 = vpop.permute.xlu0 %215 }
  0x8d   : > { %v231_v15 = vpop.permute.xlu1 %230 }
  0x8e   : > { %v221_v19 = vpop.permute.xlu0 %220 }
  0xd4   : > { %v474_v10 = vpop.f32.mrf.mxu0 }
  0xd5   : > { %v299_v11 = vadd.f32 %v474_v10, %v226_v8 }
  0xd6   : > { %v290_v12 = vpop.f32.mrf.mxu0 }
  0xd7   : > { %v453_v13 = vmul.f32 -1.442695, %v299_v11  ;;  %v291_v14 = vadd.f32 %v290_v12, %v216_v9 }
  0xd8   : > { %v475_v16 = vpop.f32.mrf.mxu0 }
  0xd9   : > { %506 = vpow2.f32 %v453_v13  ;;  %v451_v17 = vmul.f32 -1.442695, %v291_v14  ;;  %v302_v18 = vadd.f32 %v475_v16, %v231_v15 }
  0xda   : > { %v293_v20 = vpop.f32.mrf.mxu0 }
  0xdb   : > { %508 = vpow2.f32 %v451_v17  ;;  %v454_v21 = vmul.f32 -1.442695, %v302_v18  ;;  %v294_v22 = vadd.f32 %v293_v20, %v221_v19 }
  0xdd   : > { %510 = vpow2.f32 %v454_v21  ;;  %v452_v23 = vmul.f32 -1.442695, %v294_v22 }
  0xdf   : > { %512 = vpow2.f32 %v452_v23 }
  0xe6   : > { %v507_v24 = vpop.eup %506 }
  0xe7   : > { %v319_v25 = vadd.f32 1.0, %v507_v24 }
  0xe8   : > { %v509_v26 = vpop.eup %508 }
  0xe9   : > { %514 = vrcp.f32 %v319_v25  ;;  %v317_v27 = vadd.f32 1.0, %v509_v26 }
  0xea   : > { %v511_v28 = vpop.eup %510 }
  0xeb   : > { %516 = vrcp.f32 %v317_v27  ;;  %v320_v29 = vadd.f32 1.0, %v511_v28 }
  0xec   : > { %v513_v30 = vpop.eup %512 }
  0xed   : > { %518 = vrcp.f32 %v320_v29  ;;  %v318_v31 = vadd.f32 1.0, %v513_v30 }
  0xef   : > { %520 = vrcp.f32 %v318_v31 }
  0xf6   : > { %v515_v32 = vpop.eup %514 }
  0xf7   : > { %v331_v33 = vmul.f32 %v515_v32, %v299_v11 }
  0xf8   : > { %v517_v34 = vpop.eup %516 }
  0xf9   : > { %v465_v35 = vpack.c.bf16 %v331_v33, %v331_v33  ;;  %v329_v36 = vmul.f32 %v517_v34, %v291_v14 }
  0xfa   : > { %v519_v37 = vpop.eup %518 }
  0xfb   : > { %352 = vst.msk [vmem:[%s201_s8 + $0x8] sm:$0xf] %vm349_vm1, %v465_v35  ;;  %v463_v38 = vpack.c.bf16 %v329_v36, %v329_v36  ;;  %v332_v39 = vmul.f32 %v519_v37, %v302_v18 }
  0xfc   : > { %v521_v40 = vpop.eup %520 }
  0xfd   : > { %350 = vst.msk [vmem:[%s201_s8] sm:$0xf] %vm349_vm1, %v463_v38  ;;  %v466_v41 = vpack.c.bf16 %v332_v39, %v332_v39  ;;  %v330_v42 = vmul.f32 %v521_v40, %v294_v22 }
  0xff   : > { %353 = vst.msk [vmem:[%s201_s8 + $0xc] sm:$0xf] %vm349_vm1, %v466_v41  ;;  %v464_v43 = vpack.c.bf16 %v330_v42, %v330_v42 }
 0x101   : > { %351 = vst.msk [vmem:[%s201_s8 + $0x4] sm:$0xf] %vm349_vm1, %v464_v43 }
 0x102 PF: > { %s13_s14 = sadd.s32 1, %s544_s14   ;;  %s628_s12 = smov %s540_s13 }
 0x103   : > { %p10_p5 = scmp.ge.s32.totalorder %s13_s14, 4   ;;  %s629_s13 = smov %s631_s15 }
 0x105   :  { %12 = sbr.rel (!%p10_p5) target bundleno = 2 (0x2), region = 62 }

</bundles_post_ra>
